<compile_context>
chip_gen: v7x
topology: tpu7x:2x2x1
jax: 0.10.0
libtpu: 0.0.40
codegen_flags: <defaults>
</compile_context>

<pallas_src>
import jax
import jax.numpy as jnp
from jax.experimental import pallas as pl
from jax.experimental.pallas import tpu as pltpu


def _normalization_kernel(x_ref, o_ref):
    # x_ref / o_ref: (N, TILE_D) tiles, lane-dense along D.
    x = x_ref[...]                                # (N, TILE_D)
    s = jnp.sum(x, axis=0, keepdims=True)         # (1, TILE_D) reduction over the "list" axis
    inv = 1.0 / s                                 # one reciprocal per column (exact, keeps 1e-6 tol)
    o_ref[...] = x * inv                          # N cheap VPU multiplies, lane-dense store


def _pick_tile_d(n, d, max_tile=512, vmem_budget_bytes=8 << 20):
    """Lane-aligned D tile that keeps double-buffered in+out blocks small."""
    if d % 128 != 0:
        # Full-extent block along D satisfies the (8,128) rule when it equals
        # the array dim (typical toy / ragged-D case).
        return d
    td = min(max_tile, d)
    td = max(128, (td // 128) * 128)
    # 2 input buffers + 2 output buffers, f32.
    while td > 128 and 4 * n * td * 4 > vmem_budget_bytes:
        td -= 128
    return td


def normalization_layer(x_list):
    """JAX/Pallas equivalent of NormalizationLayer.forward(list_of_1d_tensors)."""
    x = jnp.stack(x_list)                         # (N, D) -- glue, stays in plain JAX
    n, d = x.shape
    td = _pick_tile_d(n, d)

    out_nd = pl.pallas_call(
        _normalization_kernel,
        out_shape=jax.ShapeDtypeStruct((n, d), x.dtype),
        grid=(pl.cdiv(d, td),),
        in_specs=[pl.BlockSpec((n, td), lambda i: (0, i))],
        out_specs=pl.BlockSpec((n, td), lambda i: (0, i)),
        compiler_params=pltpu.CompilerParams(
            dimension_semantics=("parallel",),
        ),
    )(x)
    # permute(1, 0) done in the wrapper so the kernel's stores stay lane-dense.
    return jnp.transpose(out_nd, (1, 0))          # (D, N)


def _reference(x_list):
    x = jnp.stack(x_list)
    s = jnp.sum(x, axis=0)
    return (x / s).T


if __name__ == "__main__":
    key = jax.random.PRNGKey(0)

    # Case 1: toy shape matching the module's typical use (list of 4 vectors of length 16).
    N1, D1 = 4, 16
    keys = jax.random.split(key, N1)
    # keep values positive so the sum is well away from zero
    x_list1 = [jax.random.uniform(k, (D1,), dtype=jnp.float32) + 0.5 for k in keys]
    out1 = jax.block_until_ready(normalization_layer(x_list1))
    ref1 = _reference(x_list1)
    assert out1.shape == (D1, N1), out1.shape
    assert jnp.allclose(out1, ref1, atol=1e-6, rtol=1e-6), "mismatch vs reference (small)"

    # Case 2: lane-aligned D to exercise the tiled, pipelined path.
    N2, D2 = 4, 1024
    keys2 = jax.random.split(jax.random.PRNGKey(1), N2)
    x_list2 = [jax.random.uniform(k, (D2,), dtype=jnp.float32) + 0.5 for k in keys2]
    out2 = jax.block_until_ready(normalization_layer(x_list2))
    ref2 = _reference(x_list2)
    assert out2.shape == (D2, N2), out2.shape
    assert jnp.allclose(out2, ref2, atol=1e-6, rtol=1e-6), "mismatch vs reference (tiled)"

    print("KERNEL_OK")
</pallas_src>

<mosaic_0001>
module attributes {stable_mosaic.version = 11 : i64} {
  func.func @_normalization_kernel(%arg0: i32, %arg1: memref<4x16xf32, #tpu.memory_space<vmem>>, %arg2: memref<4x16xf32, #tpu.memory_space<vmem>>) attributes {dimension_semantics = [#tpu.dimension_semantics<parallel>], iteration_bounds = array<i64: 1>, scalar_prefetch = 0 : i64, scratch_operands = 0 : i64, tpu.core_type = #tpu.core_type<tc>, window_params = [{transform_indices = @transform_0, window_bounds = array<i64: 4, 16>}, {transform_indices = @transform_1, window_bounds = array<i64: 4, 16>}]} {
    %c0 = arith.constant 0 : index
    %c0_0 = arith.constant 0 : index
    %0 = vector.load %arg1[%c0, %c0_0] : memref<4x16xf32, #tpu.memory_space<vmem>>, vector<4x16xf32>
    %cst = arith.constant dense<0.000000e+00> : vector<16xf32>
    %1 = vector.multi_reduction <add>, %0, %cst [0] : vector<4x16xf32> to vector<16xf32>
    %2 = vector.shape_cast %1 : vector<16xf32> to vector<1x16xf32>
    %cst_1 = arith.constant 1.000000e+00 : f32
    %3 = vector.broadcast %cst_1 : f32 to vector<1x16xf32>
    %4 = arith.divf %3, %2 : vector<1x16xf32>
    %5 = vector.broadcast %4 : vector<1x16xf32> to vector<4x16xf32>
    %6 = arith.mulf %0, %5 : vector<4x16xf32>
    %c0_2 = arith.constant 0 : index
    %c0_3 = arith.constant 0 : index
    %7 = vector.load %arg2[%c0_2, %c0_3] : memref<4x16xf32, #tpu.memory_space<vmem>>, vector<4x16xf32>
    tpu.vector_store %arg2[%c0_2, %c0_3], %6 {strides = array<i32>} : memref<4x16xf32, #tpu.memory_space<vmem>>, vector<4x16xf32>,
    return
  }
  func.func @transform_0(%arg0: i32) -> (i32, i32) {
    %c0_i32 = arith.constant 0 : i32
    %c0_i32_0 = arith.constant 0 : i32
    return %c0_i32, %arg0 : i32, i32
  }
  func.func @transform_1(%arg0: i32) -> (i32, i32) {
    %c0_i32 = arith.constant 0 : i32
    %c0_i32_0 = arith.constant 0 : i32
    return %c0_i32, %arg0 : i32, i32
  }
}

</mosaic_0001>

<bundles_post_ra>
// kernel: tpu_custom_call.1
= control target key start
LH: loop header
LB: loop body
LE: loop exit
PB: predicated region body
PF: predicated region fallthrough
CT: control target
= control target key end

     0   :  { %6 = vsyncpa [#allocation3], 0  ;;  %s137_s0 = inlined_call_operand.hbm [shape: f32[4,16], index: 0, kind: input, shape index: {}]   ;;  %s138_s1 = inlined_call_operand.hbm [shape: f32[4,16], index: 1, kind: output, shape index: {}]  }
   0x1   :  { %7 = vsyncpa [#allocation4], 0  ;;  %s101_s6 = smov [#allocation2]   ;;  %s53_s10 = scalar_lea.hbm %s137_s0, 64 }
   0x2   :  { %s14_s7 = sshll.u32 %s101_s6, 4  ;;  %p54_p0 = scmp.ne.s32.totalorder %s137_s0, %s53_s10  ;;  %s15_s7 = int_to_ptr.vmem [resolvable:$true] %s14_s7 }
   0x3   :  { %p57_p1 = scmp.lt.u32.totalorder %s53_s10, %s137_s0 }
   0x5   :  { %p59_p2 = pnand %p57_p1, %p54_p0 }
   0x7   :  { %62 = shalt.err (!%p59_p2)
}
   0x8   :  { %s63_s15 = scalar_lea.vmem %s15_s7, 64  ;;  %p68_p4 = scmp.lt.s32.totalorder %s15_s7, %s15_s7 }
   0x9   :  { %p64_p3 = scmp.ne.s32.totalorder %s15_s7, %s63_s15  ;;  %p69_p5 = scmp.lt.s32.totalorder %s63_s15, %s63_s15 }
   0xb   :  { %p70_p6 = por %p69_p5, %p68_p4 }
   0xd   :  { %p71_p7 = pnand %p70_p6, %p64_p3 }
   0xf   :  { %74 = shalt.err (!%p71_p7)
}
  0x10   :  { %17 = dma.hbm_to_vmem [thread:$0]  %s137_s0, 64, %s15_s7, [#allocation3]  }
  0x11   :  { %97 = dma.done.wait [#allocation3], 64  }
  0x12   :  { %98 = vsyncadd [#allocation3], 4294967232  ;;  %vm22_vm0 = vcmask 125952   ;;  %v21_v0 = vld [vmem:[#allocation2] sm:$0xf]  ;;  %s102_s18 = smov [#allocation5]  }
  0x13   :  { %v23_v1 = vsel %vm22_vm0, %v21_v0, 0.0  ;;  %s40_s19 = sshll.u32 %s102_s18, 4  ;;  %s41_s19 = int_to_ptr.vmem [resolvable:$true] %s40_s19 }
  0x14   :  { %v24_v2 = vrot.slane %v23_v1, 4  ;;  %s75_s20 = scalar_lea.vmem %s41_s19, 64  ;;  %p80_p9 = scmp.lt.s32.totalorder %s41_s19, %s41_s19 }
  0x15   :  { %p76_p8 = scmp.ne.s32.totalorder %s41_s19, %s75_s20  ;;  %p81_p10 = scmp.lt.s32.totalorder %s75_s20, %s75_s20 }
  0x16   :  { %v25_v3 = vadd.f32 %v24_v2, %v23_v1 }
  0x17   :  { %p82_p11 = por %p81_p10, %p80_p9 }
  0x18   :  { %v26_v4 = vrot.slane %v25_v3, 2 }
  0x19   :  { %p83_p12 = pnand %p82_p11, %p76_p8 }
  0x1a   :  { %v27_v5 = vadd.f32 %v26_v4, %v25_v3 }
  0x1c   :  { %v28_v6 = vrot.slane %v27_v5, 1 }
  0x1e   :  { %v29_v7 = vadd.f32 %v28_v6, %v27_v5 }
  0x20   :  { %51 = vrcp.f32 %v29_v7 }
  0x2a   :  { %v52_v8 = vpop.eup %51 }
  0x2b   :  { %v32_v9 = vmul.f32 %v52_v8, %v21_v0 }
  0x2d   :  { %33 = vst.msk [vmem:[#allocation5] sm:$0xf] %vm22_vm0, %v32_v9 }
  0x2e   :  { %86 = shalt.err (!%p83_p12)
}
  0x2f   :  { %s87_s22 = scalar_lea.hbm %s138_s1, 64 }
  0x30   :  { %p88_p13 = scmp.ne.s32.totalorder %s138_s1, %s87_s22  ;;  %p91_p0 = scmp.lt.u32.totalorder %s87_s22, %s138_s1 }
  0x32   :  { %p93_p1 = pnand %p91_p0, %p88_p13 }
  0x34   :  { %96 = shalt.err (!%p93_p1)
}
  0x35   :  { %43 = dma.vmem_to_hbm [thread:$0]  %s41_s19, 64, %s138_s1, [#allocation4]  }
  0x36   :  { %99 = dma.done.wait [#allocation4], 64  }
  0x37   :  { %100 = vsyncadd [#allocation4], 4294967232 }
  0x38   :  { %47 = vsyncpa [#allocation3], 1 }
  0x39   :  { %48 = vsyncpa [#allocation4], 1 }

</bundles_post_ra>
